<compile_context>
chip_gen: v6e
topology: v6e:2x2x1
jax: 0.10.0
libtpu: 0.0.40
codegen_flags: <defaults>
</compile_context>

<pallas_src>
import jax
import jax.numpy as jnp
from jax.experimental import pallas as pl
from jax.experimental.pallas import tpu as pltpu


def _flatten_head_kernel(x_ref, w1_ref, b1_ref, w2_ref, b2_ref, w3_ref, b3_ref,
                         o_ref):
    # x_ref: (tm, nf); w1/w2: (nf, nf); w3: (nf, tw_pad); b*: (1, nf)/(1, tw_pad)
    x = x_ref[...]
    x_f32 = x.astype(jnp.float32)

    # Layer 1: relu(x @ W1 + b1) + x     (MXU in weight dtype, f32 accumulate)
    h = jnp.dot(x.astype(w1_ref.dtype), w1_ref[...],
                preferred_element_type=jnp.float32)
    h = jnp.maximum(h + b1_ref[...].astype(jnp.float32), 0.0) + x_f32

    # Layer 2: relu(h @ W2 + b2) + h
    g = jnp.dot(h.astype(w2_ref.dtype), w2_ref[...],
                preferred_element_type=jnp.float32)
    g = jnp.maximum(g + b2_ref[...].astype(jnp.float32), 0.0) + h

    # Layer 3: g @ W3 + b3
    out = jnp.dot(g.astype(w3_ref.dtype), w3_ref[...],
                  preferred_element_type=jnp.float32)
    out = out + b3_ref[...].astype(jnp.float32)

    o_ref[...] = out.astype(o_ref.dtype)


def flatten_head_t(x, w1, b1, w2, b2, w3, b3, *, block_m=256,
                   weights_dtype=None):
    """Equivalent of Flatten_Head_t.forward (inference).

    x:  (..., d, p)  -- last two dims flattened to nf = d*p.
    w1, w2: (nf, nf), w3: (nf, target_window)   [(in, out) oriented, i.e. the
            transpose of torch.nn.Linear.weight]
    b1, b2: (nf,), b3: (target_window,)
    weights_dtype: optional dtype (e.g. jnp.bfloat16) to cast weights once for
            the native MXU path (f32 accumulation is kept).
    Returns (..., target_window).
    """
    *lead, d, p = x.shape
    nf = d * p
    assert w1.shape == (nf, nf) and w2.shape == (nf, nf)
    assert w3.shape[0] == nf
    tw = w3.shape[1]

    M = 1
    for s in lead:
        M *= s
    x2 = x.reshape(M, nf)

    if weights_dtype is not None:
        w1 = w1.astype(weights_dtype)
        w2 = w2.astype(weights_dtype)
        w3 = w3.astype(weights_dtype)

    # Lane-dense output: pad target_window up to a multiple of 128.
    tw_pad = pl.cdiv(tw, 128) * 128
    if tw_pad != tw:
        w3p = jnp.pad(w3, ((0, 0), (0, tw_pad - tw)))
        b3p = jnp.pad(b3, (0, tw_pad - tw))
    else:
        w3p, b3p = w3, b3

    # Biases as 2-D f32 rows (elementwise math stays f32 -> v5e friendly).
    b1r = b1.reshape(1, nf).astype(jnp.float32)
    b2r = b2.reshape(1, nf).astype(jnp.float32)
    b3r = b3p.reshape(1, tw_pad).astype(jnp.float32)

    # Row tile: sublane aligned; ensure >= 2 grid steps when M > 8 so both
    # v7x TensorCores get work via the "parallel" grid axis.
    if M <= 8:
        tm = 8
    else:
        tm = min(block_m, ((pl.cdiv(M, 2) + 7) // 8) * 8)
    grid_m = pl.cdiv(M, tm)   # no wrapper-side pad; Pallas masks the tail block

    # Cost hint for XLA scheduling around the custom call.
    out_itemsize = jnp.dtype(x.dtype).itemsize
    flops = 2 * M * nf * (2 * nf + tw_pad)
    bytes_accessed = (x2.size * x2.dtype.itemsize
                      + w1.size * w1.dtype.itemsize
                      + w2.size * w2.dtype.itemsize
                      + w3p.size * w3p.dtype.itemsize
                      + (b1r.size + b2r.size + b3r.size) * 4
                      + M * tw_pad * out_itemsize)
    cost = pl.CostEstimate(flops=flops, transcendentals=0,
                           bytes_accessed=bytes_accessed)

    # Raise the scoped VMEM limit only if the resident weights need it.
    weight_bytes = (w1.size * w1.dtype.itemsize + w2.size * w2.dtype.itemsize
                    + w3p.size * w3p.dtype.itemsize
                    + (b1r.size + b2r.size + b3r.size) * 4)
    io_bytes = 2 * tm * nf * x2.dtype.itemsize + 2 * tm * tw_pad * out_itemsize
    tmp_bytes = 4 * tm * max(nf, tw_pad) * 4   # f32 x/h/g/out temporaries
    needed = weight_bytes + io_bytes + tmp_bytes
    cparams = {"dimension_semantics": ("parallel",)}
    if needed > 32 * 1024 * 1024:
        # TODO(synk): for very large nf (v7x's 64 MiB VMEM) split into per-layer
        # K-tiled pallas_calls instead of keeping all three weights resident.
        cparams["vmem_limit_bytes"] = int(min(needed + (4 << 20),
                                              100 * 1024 * 1024))

    out = pl.pallas_call(
        _flatten_head_kernel,
        out_shape=jax.ShapeDtypeStruct((M, tw_pad), x.dtype),
        grid_spec=pltpu.PrefetchScalarGridSpec(
            num_scalar_prefetch=0,
            grid=(grid_m,),
            in_specs=[
                pl.BlockSpec((tm, nf), lambda i: (i, 0)),            # x rows
                pl.BlockSpec((nf, nf), lambda i: (0, 0),             # W1 resident
                             pipeline_mode=pl.Buffered(1)),
                pl.BlockSpec((1, nf), lambda i: (0, 0),              # b1
                             pipeline_mode=pl.Buffered(1)),
                pl.BlockSpec((nf, nf), lambda i: (0, 0),             # W2 resident
                             pipeline_mode=pl.Buffered(1)),
                pl.BlockSpec((1, nf), lambda i: (0, 0),              # b2
                             pipeline_mode=pl.Buffered(1)),
                pl.BlockSpec((nf, tw_pad), lambda i: (0, 0),         # W3 resident
                             pipeline_mode=pl.Buffered(1)),
                pl.BlockSpec((1, tw_pad), lambda i: (0, 0),          # b3
                             pipeline_mode=pl.Buffered(1)),
            ],
            out_specs=pl.BlockSpec((tm, tw_pad), lambda i: (i, 0)),  # lane-dense
        ),
        compiler_params=pltpu.CompilerParams(**cparams),
        cost_estimate=cost,
    )(x2, w1, b1r, w2, b2r, w3p, b3r)

    if tw_pad != tw:
        out = out[:, :tw]
    return out.reshape(*lead, tw)


if __name__ == "__main__":
    key = jax.random.PRNGKey(0)

    # Small shapes consistent with the Fredformer head:
    # x: (batch, n_vars, d_model, patch_num) -> nf = d_model * patch_num
    B, n_vars, d_model, patch_num = 2, 4, 16, 8
    nf = d_model * patch_num                 # 128 (lane-dense)
    target_window = 96                       # exercises the lane-pad path

    ks = jax.random.split(key, 7)
    x = jax.random.normal(ks[0], (B, n_vars, d_model, patch_num), jnp.float32)
    w1 = jax.random.normal(ks[1], (nf, nf), jnp.float32) * 0.05
    b1 = jax.random.normal(ks[2], (nf,), jnp.float32) * 0.05
    w2 = jax.random.normal(ks[3], (nf, nf), jnp.float32) * 0.05
    b2 = jax.random.normal(ks[4], (nf,), jnp.float32) * 0.05
    w3 = jax.random.normal(ks[5], (nf, target_window), jnp.float32) * 0.05
    b3 = jax.random.normal(ks[6], (target_window,), jnp.float32) * 0.05

    # Pure-JAX reference (same math as the PyTorch forward, eval mode).
    xf = x.reshape(B, n_vars, nf)
    h = jax.nn.relu(xf @ w1 + b1) + xf
    g = jax.nn.relu(h @ w2 + b2) + h
    ref = g @ w3 + b3

    # f32 path (matches PyTorch numerics).
    out = flatten_head_t(x, w1, b1, w2, b2, w3, b3)
    out = jax.block_until_ready(out)
    assert out.shape == ref.shape, (out.shape, ref.shape)
    assert jnp.allclose(out, ref, atol=1e-4, rtol=1e-4)

    # bf16 MXU path (weights cast once in the wrapper, f32 accumulation).
    out_bf16 = flatten_head_t(x.astype(jnp.bfloat16), w1, b1, w2, b2, w3, b3,
                              weights_dtype=jnp.bfloat16)
    out_bf16 = jax.block_until_ready(out_bf16)
    assert out_bf16.shape == ref.shape
    assert jnp.allclose(out_bf16.astype(jnp.float32), ref, atol=1e-1, rtol=1e-1)

    print("KERNEL_OK")
</pallas_src>

<mosaic_0001>
module attributes {stable_mosaic.version = 11 : i64} {
  func.func @_flatten_head_kernel(%arg0: i32, %arg1: memref<8x128xf32, #tpu.memory_space<vmem>>, %arg2: memref<128x128xf32, #tpu.memory_space<vmem>>, %arg3: memref<1x128xf32, #tpu.memory_space<vmem>>, %arg4: memref<128x128xf32, #tpu.memory_space<vmem>>, %arg5: memref<1x128xf32, #tpu.memory_space<vmem>>, %arg6: memref<128x128xf32, #tpu.memory_space<vmem>>, %arg7: memref<1x128xf32, #tpu.memory_space<vmem>>, %arg8: memref<8x128xf32, #tpu.memory_space<vmem>>) attributes {dimension_semantics = [#tpu.dimension_semantics<parallel>], iteration_bounds = array<i64: 1>, scalar_prefetch = 0 : i64, scratch_operands = 0 : i64, tpu.core_type = #tpu.core_type<tc>, window_params = [{transform_indices = @transform_0, window_bounds = array<i64: 8, 128>}, {pipeline_mode = #tpu.pipeline_mode<synchronous>, transform_indices = @transform_1, window_bounds = array<i64: 128, 128>}, {pipeline_mode = #tpu.pipeline_mode<synchronous>, transform_indices = @transform_2, window_bounds = array<i64: 1, 128>}, {pipeline_mode = #tpu.pipeline_mode<synchronous>, transform_indices = @transform_3, window_bounds = array<i64: 128, 128>}, {pipeline_mode = #tpu.pipeline_mode<synchronous>, transform_indices = @transform_4, window_bounds = array<i64: 1, 128>}, {pipeline_mode = #tpu.pipeline_mode<synchronous>, transform_indices = @transform_5, window_bounds = array<i64: 128, 128>}, {pipeline_mode = #tpu.pipeline_mode<synchronous>, transform_indices = @transform_6, window_bounds = array<i64: 1, 128>}, {transform_indices = @transform_7, window_bounds = array<i64: 8, 128>}]} {
    %c0 = arith.constant 0 : index
    %c0_0 = arith.constant 0 : index
    %0 = vector.load %arg1[%c0, %c0_0] : memref<8x128xf32, #tpu.memory_space<vmem>>, vector<8x128xf32>
    %c0_1 = arith.constant 0 : index
    %c0_2 = arith.constant 0 : index
    %1 = vector.load %arg2[%c0_1, %c0_2] : memref<128x128xf32, #tpu.memory_space<vmem>>, vector<128x128xf32>
    %cst = arith.constant dense<0.000000e+00> : vector<8x128xf32>
    %2 = tpu.matmul %0, %1, %cst {dimension_numbers = #tpu.dot_dimension_numbers<[1], [0], [0], [1], [0, 0, 1, 1], [], []>} : vector<8x128xf32>, vector<128x128xf32>, vector<8x128xf32> -> vector<8x128xf32>
    %c0_3 = arith.constant 0 : index
    %c0_4 = arith.constant 0 : index
    %3 = vector.load %arg3[%c0_3, %c0_4] : memref<1x128xf32, #tpu.memory_space<vmem>>, vector<1x128xf32>
    %4 = vector.broadcast %3 : vector<1x128xf32> to vector<8x128xf32>
    %5 = arith.addf %2, %4 : vector<8x128xf32>
    %cst_5 = arith.constant 0.000000e+00 : f32
    %6 = vector.broadcast %cst_5 : f32 to vector<8x128xf32>
    %7 = arith.maximumf %5, %6 : vector<8x128xf32>
    %8 = arith.addf %7, %0 : vector<8x128xf32>
    %c0_6 = arith.constant 0 : index
    %c0_7 = arith.constant 0 : index
    %9 = vector.load %arg4[%c0_6, %c0_7] : memref<128x128xf32, #tpu.memory_space<vmem>>, vector<128x128xf32>
    %cst_8 = arith.constant dense<0.000000e+00> : vector<8x128xf32>
    %10 = tpu.matmul %8, %9, %cst_8 {dimension_numbers = #tpu.dot_dimension_numbers<[1], [0], [0], [1], [0, 0, 1, 1], [], []>} : vector<8x128xf32>, vector<128x128xf32>, vector<8x128xf32> -> vector<8x128xf32>
    %c0_9 = arith.constant 0 : index
    %c0_10 = arith.constant 0 : index
    %11 = vector.load %arg5[%c0_9, %c0_10] : memref<1x128xf32, #tpu.memory_space<vmem>>, vector<1x128xf32>
    %12 = vector.broadcast %11 : vector<1x128xf32> to vector<8x128xf32>
    %13 = arith.addf %10, %12 : vector<8x128xf32>
    %cst_11 = arith.constant 0.000000e+00 : f32
    %14 = vector.broadcast %cst_11 : f32 to vector<8x128xf32>
    %15 = arith.maximumf %13, %14 : vector<8x128xf32>
    %16 = arith.addf %15, %8 : vector<8x128xf32>
    %c0_12 = arith.constant 0 : index
    %c0_13 = arith.constant 0 : index
    %17 = vector.load %arg6[%c0_12, %c0_13] : memref<128x128xf32, #tpu.memory_space<vmem>>, vector<128x128xf32>
    %cst_14 = arith.constant dense<0.000000e+00> : vector<8x128xf32>
    %18 = tpu.matmul %16, %17, %cst_14 {dimension_numbers = #tpu.dot_dimension_numbers<[1], [0], [0], [1], [0, 0, 1, 1], [], []>} : vector<8x128xf32>, vector<128x128xf32>, vector<8x128xf32> -> vector<8x128xf32>
    %c0_15 = arith.constant 0 : index
    %c0_16 = arith.constant 0 : index
    %19 = vector.load %arg7[%c0_15, %c0_16] : memref<1x128xf32, #tpu.memory_space<vmem>>, vector<1x128xf32>
    %20 = vector.broadcast %19 : vector<1x128xf32> to vector<8x128xf32>
    %21 = arith.addf %18, %20 : vector<8x128xf32>
    %c0_17 = arith.constant 0 : index
    %c0_18 = arith.constant 0 : index
    %22 = vector.load %arg8[%c0_17, %c0_18] : memref<8x128xf32, #tpu.memory_space<vmem>>, vector<8x128xf32>
    tpu.vector_store %arg8[%c0_17, %c0_18], %21 {strides = array<i32>} : memref<8x128xf32, #tpu.memory_space<vmem>>, vector<8x128xf32>,
    return
  }
  func.func @transform_0(%arg0: i32) -> (i32, i32) {
    %c0_i32 = arith.constant 0 : i32
    %c0_i32_0 = arith.constant 0 : i32
    return %arg0, %c0_i32 : i32, i32
  }
  func.func @transform_1(%arg0: i32) -> (i32, i32) {
    %c0_i32 = arith.constant 0 : i32
    %c0_i32_0 = arith.constant 0 : i32
    %c0_i32_1 = arith.constant 0 : i32
    return %c0_i32, %c0_i32_0 : i32, i32
  }
  func.func @transform_2(%arg0: i32) -> (i32, i32) {
    %c0_i32 = arith.constant 0 : i32
    %c0_i32_0 = arith.constant 0 : i32
    %c0_i32_1 = arith.constant 0 : i32
    return %c0_i32, %c0_i32_0 : i32, i32
  }
  func.func @transform_3(%arg0: i32) -> (i32, i32) {
    %c0_i32 = arith.constant 0 : i32
    %c0_i32_0 = arith.constant 0 : i32
    %c0_i32_1 = arith.constant 0 : i32
    return %c0_i32, %c0_i32_0 : i32, i32
  }
  func.func @transform_4(%arg0: i32) -> (i32, i32) {
    %c0_i32 = arith.constant 0 : i32
    %c0_i32_0 = arith.constant 0 : i32
    %c0_i32_1 = arith.constant 0 : i32
    return %c0_i32, %c0_i32_0 : i32, i32
  }
  func.func @transform_5(%arg0: i32) -> (i32, i32) {
    %c0_i32 = arith.constant 0 : i32
    %c0_i32_0 = arith.constant 0 : i32
    %c0_i32_1 = arith.constant 0 : i32
    return %c0_i32, %c0_i32_0 : i32, i32
  }
  func.func @transform_6(%arg0: i32) -> (i32, i32) {
    %c0_i32 = arith.constant 0 : i32
    %c0_i32_0 = arith.constant 0 : i32
    %c0_i32_1 = arith.constant 0 : i32
    return %c0_i32, %c0_i32_0 : i32, i32
  }
  func.func @transform_7(%arg0: i32) -> (i32, i32) {
    %c0_i32 = arith.constant 0 : i32
    %c0_i32_0 = arith.constant 0 : i32
    return %arg0, %c0_i32 : i32, i32
  }
}

</mosaic_0001>

<bundles_post_ra>
// kernel: tpu_custom_call.1
= control target key start
LH: loop header
LB: loop body
LE: loop exit
PB: predicated region body
PF: predicated region fallthrough
CT: control target
= control target key end

     0   :  { %12 = vsyncpa [#allocation3], 0  ;;  %s794_s0 = inlined_call_operand.hbm [shape: f32[8,128], index: 0, kind: input, shape index: {}]   ;;  %s795_s1 = inlined_call_operand.hbm [shape: f32[128,128], index: 1, kind: input, shape index: {}]   ;;  %s796_s2 = inlined_call_operand.vmem [shape: f32[1,128], index: 2, kind: input, shape index: {}]   ;;  %s797_s3 = inlined_call_operand.hbm [shape: f32[128,128], index: 3, kind: input, shape index: {}]   ;;  %s798_s4 = inlined_call_operand.vmem [shape: f32[1,128], index: 4, kind: input, shape index: {}]   ;;  %s799_s5 = inlined_call_operand.hbm [shape: f32[128,128], index: 5, kind: input, shape index: {}]   ;;  %s800_s6 = inlined_call_operand.vmem [shape: f32[1,128], index: 6, kind: input, shape index: {}]   ;;  %s801_s7 = inlined_call_operand.hbm [shape: f32[8,128], index: 7, kind: output, shape index: {}]  }
   0x1   :  { %13 = vsyncpa [#allocation6], 0 }
   0x2   :  { %14 = vsyncpa [#allocation9], 0 }
   0x3   :  { %15 = vsyncpa [#allocation4], 0  ;;  %s658_s24 = smov [#allocation5]  }
   0x4   :  { %s31_s25 = sshll.u32 %s658_s24, 4  ;;  %s32_s25 = int_to_ptr.vmem [resolvable:$true] %s31_s25 }
   0x5   :  { %s558_s26 = scalar_lea.vmem %s32_s25, 2048  ;;  %p563_p1 = scmp.lt.s32.totalorder %s32_s25, %s32_s25 }
   0x6   :  { %p559_p0 = scmp.ne.s32.totalorder %s32_s25, %s558_s26  ;;  %p564_p2 = scmp.lt.s32.totalorder %s558_s26, %s558_s26 }
   0x8   :  { %p565_p3 = por %p564_p2, %p563_p1 }
   0xa   :  { %p566_p4 = pnand %p565_p3, %p559_p0 }
   0xc   :  { %569 = shalt.err (!%p566_p4)
}
   0xd   :  { %s659_s27 = smov 128   ;;  %s660_s28 = smov 8  }
   0xe   :  { %37 = dma.hbm_to_vmem [thread:$0]  %s795_s1, 2048, %s32_s25, [#allocation6], %s659_s27, %s659_s27, %s660_s28  }
   0xf   :  { %s661_s8 = smov [#allocation2]   ;;  %s662_s10 = smov [#allocation7]  }
  0x10   :  { %s22_s9 = sshll.u32 %s661_s8, 4  ;;  %s45_s11 = sshll.u32 %s662_s10, 4  ;;  %s23_s9 = int_to_ptr.vmem [resolvable:$true] %s22_s9  ;;  %s46_s11 = int_to_ptr.vmem [resolvable:$true] %s45_s11 }
  0x11   :  { %s578_s12 = scalar_lea.vmem %s23_s9, 128  ;;  %p583_p6 = scmp.lt.s32.totalorder %s23_s9, %s23_s9 }
  0x12   :  { %p579_p5 = scmp.ne.s32.totalorder %s23_s9, %s578_s12  ;;  %p584_p7 = scmp.lt.s32.totalorder %s578_s12, %s578_s12 }
  0x14   :  { %p585_p8 = por %p584_p7, %p583_p6 }
  0x16   :  { %p586_p9 = pnand %p585_p8, %p579_p5 }
  0x18   :  { %589 = shalt.err (!%p586_p9)
}
  0x19   :  { %25 = dma.hbm_to_vmem [thread:$0]  %s794_s0, 128, %s23_s9, [#allocation3]  }
  0x1a   :  { %s598_s15 = scalar_lea.vmem %s46_s11, 2048  ;;  %p603_p11 = scmp.lt.s32.totalorder %s46_s11, %s46_s11 }
  0x1b   :  { %p599_p10 = scmp.ne.s32.totalorder %s46_s11, %s598_s15  ;;  %p604_p12 = scmp.lt.s32.totalorder %s598_s15, %s598_s15 }
  0x1d   :  { %p605_p13 = por %p604_p12, %p603_p11 }
  0x1f   :  { %p606_p0 = pnand %p605_p13, %p599_p10 }
  0x21   :  { %609 = shalt.err (!%p606_p0)
}
  0x22   :  { %51 = dma.hbm_to_vmem [thread:$0]  %s797_s3, 2048, %s46_s11, [#allocation6], %s659_s27, %s659_s27, %s660_s28  }
  0x23   :  { %s663_s17 = smov [#allocation8]  }
  0x24   :  { %s59_s18 = sshll.u32 %s663_s17, 4  ;;  %s60_s18 = int_to_ptr.vmem [resolvable:$true] %s59_s18 }
  0x25   :  { %s618_s19 = scalar_lea.vmem %s60_s18, 2048  ;;  %p623_p2 = scmp.lt.s32.totalorder %s60_s18, %s60_s18 }
  0x26   :  { %p619_p1 = scmp.ne.s32.totalorder %s60_s18, %s618_s19  ;;  %p624_p3 = scmp.lt.s32.totalorder %s618_s19, %s618_s19 }
  0x28   :  { %p625_p4 = por %p624_p3, %p623_p2 }
  0x2a   :  { %p626_p5 = pnand %p625_p4, %p619_p1 }
  0x2c   :  { %629 = shalt.err (!%p626_p5)
}
  0x2d   :  { %65 = dma.hbm_to_vmem [thread:$0]  %s799_s5, 2048, %s60_s18, [#allocation9], %s659_s27, %s659_s27, %s660_s28  }
  0x2e   :  { %650 = dma.done.wait [#allocation3], 128  }
  0x2f   :  { %651 = vsyncadd [#allocation3], 4294967168 }
  0x30   :  { %652 = dma.done.wait [#allocation6], 4096  }
  0x31   :  { %653 = vsyncadd [#allocation6], 4294963200 }
  0x32   :  { %654 = dma.done.wait [#allocation9], 2048  }
  0x33   :  { %655 = vsyncadd [#allocation9], 4294965248  ;;  %v664_v0 = vmov 0.0   ;;  %vm665_vm0 = vmmov 0   ;;  %v96_v1 = vld [vmem:[#allocation5 + $0x78] sm:$0xff]  ;;  %v95_v2 = vld [vmem:[#allocation5 + $0x70] sm:$0xff] }
  0x34   :  { %436 = vmatprep.subr.mxu0 %v664_v0  ;;  %468 = vmatprep.mubr.msk.f32.mxu0 %vm665_vm0, %v664_v0  ;;  %v94_v3 = vld [vmem:[#allocation5 + $0x68] sm:$0xff]  ;;  %v93_v4 = vld [vmem:[#allocation5 + $0x60] sm:$0xff]  ;;  %v191_v5 = vld [vmem:[#allocation7 + $0x78] sm:$0xff]  ;;  %s666_s24 = smov [#allocation10]  }
  0x35   :  { %471 = vmatprep.subr.mxu1 %v664_v0  ;;  %503 = vmatprep.mubr.msk.f32.mxu1 %vm665_vm0, %v664_v0  ;;  %v92_v6 = vld [vmem:[#allocation5 + $0x58] sm:$0xff]  ;;  %v190_v7 = vld [vmem:[#allocation7 + $0x70] sm:$0xff]  ;;  %v189_v8 = vld [vmem:[#allocation7 + $0x68] sm:$0xff]  ;;  %s371_s25 = sshll.u32 %s666_s24, 4  ;;  %s372_s25 = int_to_ptr.vmem [resolvable:$true] %s371_s25 }
  0x36   :  { %437 = vmatpush3.msra.mxu0 %v96_v1  ;;  %472 = vmatpush3.msra.mxu1 %v191_v5  ;;  %v91_v9 = vld [vmem:[#allocation5 + $0x50] sm:$0xff]  ;;  %v188_v10 = vld [vmem:[#allocation7 + $0x60] sm:$0xff]  ;;  %v90_v11 = vld [vmem:[#allocation5 + $0x48] sm:$0xff]  ;;  %s630_s26 = scalar_lea.vmem %s372_s25, 128  ;;  %p635_p7 = scmp.lt.s32.totalorder %s372_s25, %s372_s25 }
  0x37   :  { %438 = vmatprep.subr.mxu0 %v664_v0  ;;  %473 = vmatprep.subr.mxu1 %v664_v0  ;;  %v187_v12 = vld [vmem:[#allocation7 + $0x58] sm:$0xff]  ;;  %v89_v13 = vld [vmem:[#allocation5 + $0x40] sm:$0xff]  ;;  %v186_v14 = vld [vmem:[#allocation7 + $0x50] sm:$0xff]  ;;  %p631_p6 = scmp.ne.s32.totalorder %s372_s25, %s630_s26  ;;  %p636_p8 = scmp.lt.s32.totalorder %s630_s26, %s630_s26 }
  0x38   :  { %439 = vmatpush3.msra.mxu0 %v95_v2  ;;  %474 = vmatpush3.msra.mxu1 %v190_v7  ;;  %v88_v15 = vld [vmem:[#allocation5 + $0x38] sm:$0xff]  ;;  %v185_v16 = vld [vmem:[#allocation7 + $0x48] sm:$0xff]  ;;  %v87_v17 = vld [vmem:[#allocation5 + $0x30] sm:$0xff] }
  0x39   :  { %440 = vmatprep.subr.mxu0 %v664_v0  ;;  %475 = vmatprep.subr.mxu1 %v664_v0  ;;  %v184_v18 = vld [vmem:[#allocation7 + $0x40] sm:$0xff]  ;;  %v86_v19 = vld [vmem:[#allocation5 + $0x28] sm:$0xff]  ;;  %v183_v20 = vld [vmem:[#allocation7 + $0x38] sm:$0xff]  ;;  %p637_p9 = por %p636_p8, %p635_p7 }
  0x3a   :  { %441 = vmatpush3.msra.mxu0 %v94_v3  ;;  %476 = vmatpush3.msra.mxu1 %v189_v8  ;;  %v85_v21 = vld [vmem:[#allocation5 + $0x20] sm:$0xff]  ;;  %v182_v22 = vld [vmem:[#allocation7 + $0x30] sm:$0xff]  ;;  %v84_v23 = vld [vmem:[#allocation5 + $0x18] sm:$0xff] }
  0x3b   :  { %442 = vmatprep.subr.mxu0 %v664_v0  ;;  %477 = vmatprep.subr.mxu1 %v664_v0  ;;  %v181_v24 = vld [vmem:[#allocation7 + $0x28] sm:$0xff]  ;;  %v83_v25 = vld [vmem:[#allocation5 + $0x10] sm:$0xff]  ;;  %v180_v26 = vld [vmem:[#allocation7 + $0x20] sm:$0xff]  ;;  %p638_p10 = pnand %p637_p9, %p631_p6 }
  0x3c   :  { %443 = vmatpush3.msra.mxu0 %v93_v4  ;;  %478 = vmatpush3.msra.mxu1 %v188_v10  ;;  %v82_v27 = vld [vmem:[#allocation5 + $0x8] sm:$0xff]  ;;  %v81_v28 = vld [vmem:[#allocation5] sm:$0xff]  ;;  %v80_v29 = vld [vmem:[#allocation2] sm:$0xff] }
  0x3d   :  { %444 = vmatprep.subr.mxu0 %v664_v0  ;;  %479 = vmatprep.subr.mxu1 %v664_v0  ;;  %v179_v30 = vld [vmem:[#allocation7 + $0x18] sm:$0xff]  ;;  %v178_v31 = vld [vmem:[#allocation7 + $0x10] sm:$0xff]  ;;  %v177_v32 = vld [vmem:[#allocation7 + $0x8] sm:$0xff] }
  0x3e   :  { %445 = vmatpush3.msra.mxu0 %v92_v6  ;;  %480 = vmatpush3.msra.mxu1 %v187_v12  ;;  %v176_v33 = vld [vmem:[#allocation7] sm:$0xff]  ;;  %v286_v34 = vld [vmem:[#allocation8 + $0x78] sm:$0xff]  ;;  %v285_v35 = vld [vmem:[#allocation8 + $0x70] sm:$0xff] }
  0x3f   :  { %446 = vmatprep.subr.mxu0 %v664_v0  ;;  %481 = vmatprep.subr.mxu1 %v664_v0  ;;  %v284_v36 = vld [vmem:[#allocation8 + $0x68] sm:$0xff]  ;;  %v283_v37 = vld [vmem:[#allocation8 + $0x60] sm:$0xff]  ;;  %v282_v38 = vld [vmem:[#allocation8 + $0x58] sm:$0xff] }
  0x40   :  { %447 = vmatpush3.msra.mxu0 %v91_v9  ;;  %482 = vmatpush3.msra.mxu1 %v186_v14  ;;  %v281_v39 = vld [vmem:[#allocation8 + $0x50] sm:$0xff]  ;;  %v280_v40 = vld [vmem:[#allocation8 + $0x48] sm:$0xff]  ;;  %v279_v41 = vld [vmem:[#allocation8 + $0x40] sm:$0xff] }
  0x41   :  { %448 = vmatprep.subr.mxu0 %v664_v0  ;;  %483 = vmatprep.subr.mxu1 %v664_v0  ;;  %v278_v42 = vld [vmem:[#allocation8 + $0x38] sm:$0xff]  ;;  %v277_v43 = vld [vmem:[#allocation8 + $0x30] sm:$0xff]  ;;  %v276_v44 = vld [vmem:[#allocation8 + $0x28] sm:$0xff] }
  0x42   :  { %449 = vmatpush3.msra.mxu0 %v90_v11  ;;  %484 = vmatpush3.msra.mxu1 %v185_v16  ;;  %v275_v45 = vld [vmem:[#allocation8 + $0x20] sm:$0xff]  ;;  %v382_v46 = vld [vmem:[%s796_s2] ss:$0 sm:$0xff]  ;;  %v273_v53 = vld [vmem:[#allocation8 + $0x10] sm:$0xff] }
  0x43   :  { %450 = vmatprep.subr.mxu0 %v664_v0  ;;  %485 = vmatprep.subr.mxu1 %v664_v0  ;;  %v274_v52 = vld [vmem:[#allocation8 + $0x18] sm:$0xff]  ;;  %v272_v54 = vld [vmem:[#allocation8 + $0x8] sm:$0xff]  ;;  %v271_v55 = vld [vmem:[#allocation8] sm:$0xff] }
  0x44   :  { %451 = vmatpush3.msra.mxu0 %v89_v13  ;;  %486 = vmatpush3.msra.mxu1 %v184_v18  ;;  %v383_v56 = vld [vmem:[%s798_s4] ss:$0 sm:$0xff] }
  0x45   :  { %452 = vmatprep.subr.mxu0 %v664_v0  ;;  %487 = vmatprep.subr.mxu1 %v664_v0  ;;  %v384_v62 = vld [vmem:[%s800_s6] ss:$0 sm:$0xff] }
  0x46   :  { %453 = vmatpush3.msra.mxu0 %v88_v15  ;;  %488 = vmatpush3.msra.mxu1 %v183_v20 }
  0x47   :  { %454 = vmatprep.subr.mxu0 %v664_v0  ;;  %489 = vmatprep.subr.mxu1 %v664_v0 }
  0x48   :  { %455 = vmatpush3.msra.mxu0 %v87_v17  ;;  %490 = vmatpush3.msra.mxu1 %v182_v22 }
  0x49   :  { %456 = vmatprep.subr.mxu0 %v664_v0  ;;  %491 = vmatprep.subr.mxu1 %v664_v0 }
  0x4a   :  { %457 = vmatpush3.msra.mxu0 %v86_v19  ;;  %492 = vmatpush3.msra.mxu1 %v181_v24 }
  0x4b   :  { %458 = vmatprep.subr.mxu0 %v664_v0  ;;  %493 = vmatprep.subr.mxu1 %v664_v0 }
  0x4c   :  { %459 = vmatpush3.msra.mxu0 %v85_v21  ;;  %494 = vmatpush3.msra.mxu1 %v180_v26 }
  0x4d   :  { %460 = vmatprep.subr.mxu0 %v664_v0  ;;  %495 = vmatprep.subr.mxu1 %v664_v0 }
  0x4e   :  { %461 = vmatpush3.msra.mxu0 %v84_v23  ;;  %496 = vmatpush3.msra.mxu1 %v179_v30 }
  0x4f   :  { %462 = vmatprep.subr.mxu0 %v664_v0  ;;  %497 = vmatprep.subr.mxu1 %v664_v0 }
  0x50   :  { %463 = vmatpush3.msra.mxu0 %v83_v25  ;;  %498 = vmatpush3.msra.mxu1 %v178_v31 }
  0x51   :  { %464 = vmatprep.subr.mxu0 %v664_v0  ;;  %499 = vmatprep.subr.mxu1 %v664_v0 }
  0x52   :  { %465 = vmatpush3.msra.mxu0 %v82_v27  ;;  %500 = vmatpush3.msra.mxu1 %v177_v32 }
  0x53   :  { %466 = vmatprep.subr.mxu0 %v664_v0  ;;  %501 = vmatprep.subr.mxu1 %v664_v0 }
  0x54   :  { %467 = vmatpush3.msra.mxu0 %v81_v28  ;;  %502 = vmatpush3.msra.mxu1 %v176_v33 }
  0x55   :  { %469 = vmatmul.mubr.f32.vlgmr.msra.gmra.mxu0 %v80_v29  ;;  %506 = vmatprep.subr.mxu0 %v664_v0 }
  0x56   :  { %538 = vmatprep.mubr.msk.f32.mxu0 %vm665_vm0, %v664_v0  ;;  %507 = vmatpush3.msra.mxu0 %v286_v34 }
  0x57   :  { %508 = vmatprep.subr.mxu0 %v664_v0 }
  0x58   :  { %509 = vmatpush3.msra.mxu0 %v285_v35 }
  0x59   :  { %510 = vmatprep.subr.mxu0 %v664_v0 }
  0x5a   :  { %511 = vmatpush3.msra.mxu0 %v284_v36 }
  0x5b   :  { %512 = vmatprep.subr.mxu0 %v664_v0 }
  0x5c   :  { %513 = vmatpush3.msra.mxu0 %v283_v37 }
  0x5d   :  { %514 = vmatprep.subr.mxu0 %v664_v0 }
  0x5e   :  { %515 = vmatpush3.msra.mxu0 %v282_v38 }
  0x5f   :  { %516 = vmatprep.subr.mxu0 %v664_v0 }
  0x60   :  { %517 = vmatpush3.msra.mxu0 %v281_v39 }
  0x61   :  { %518 = vmatprep.subr.mxu0 %v664_v0 }
  0x62   :  { %519 = vmatpush3.msra.mxu0 %v280_v40 }
  0x63   :  { %520 = vmatprep.subr.mxu0 %v664_v0 }
  0x64   :  { %521 = vmatpush3.msra.mxu0 %v279_v41 }
  0x65   :  { %522 = vmatprep.subr.mxu0 %v664_v0 }
  0x66   :  { %523 = vmatpush3.msra.mxu0 %v278_v42 }
  0x67   :  { %524 = vmatprep.subr.mxu0 %v664_v0 }
  0x68   :  { %525 = vmatpush3.msra.mxu0 %v277_v43 }
  0x69   :  { %526 = vmatprep.subr.mxu0 %v664_v0 }
  0x6a   :  { %527 = vmatpush3.msra.mxu0 %v276_v44 }
  0x6b   :  { %528 = vmatprep.subr.mxu0 %v664_v0 }
  0x6c   :  { %529 = vmatpush3.msra.mxu0 %v275_v45 }
  0x6d   :  { %530 = vmatprep.subr.mxu0 %v664_v0 }
  0x6e   :  { %531 = vmatpush3.msra.mxu0 %v274_v52 }
  0x6f   :  { %532 = vmatprep.subr.mxu0 %v664_v0 }
  0x70   :  { %533 = vmatpush3.msra.mxu0 %v273_v53 }
  0x71   :  { %534 = vmatprep.subr.mxu0 %v664_v0 }
  0x72   :  { %535 = vmatpush3.msra.mxu0 %v272_v54 }
  0x73   :  { %536 = vmatprep.subr.mxu0 %v664_v0 }
  0x74   :  { %537 = vmatpush3.msra.mxu0 %v271_v55 }
 0x115   :  { %v170_v47 = vpop.f32.mrf.mxu0 }
 0x116   :  { %v171_v48 = vadd.f32 %v382_v46, %v170_v47 }
 0x117   :  { %v470_v49 = vpop.f32.mrf.mxu0 }
 0x118   :  { %v174_v50 = vmax.f32 %v171_v48, 0.0 }
 0x11a   :  { %v175_v51 = vadd.f32 %v174_v50, %v80_v29 }
 0x11c   :  { %504 = vmatmul.mubr.f32.vlgmr.msra.gmra.mxu1 %v175_v51 }
 0x1dc   :  { %v265_v57 = vpop.f32.mrf.mxu1 }
 0x1dd   :  { %v266_v58 = vadd.f32 %v383_v56, %v265_v57 }
 0x1de   :  { %v505_v59 = vpop.f32.mrf.mxu1 }
 0x1df   :  { %v269_v60 = vmax.f32 %v266_v58, 0.0 }
 0x1e1   :  { %v270_v61 = vadd.f32 %v269_v60, %v175_v51 }
 0x1e3   :  { %539 = vmatmul.mubr.f32.vlgmr.msra.gmra.mxu0 %v270_v61 }
 0x2a3   :  { %v360_v63 = vpop.f32.mrf.mxu0 }
 0x2a4   :  { %v361_v0 = vadd.f32 %v384_v62, %v360_v63 }
 0x2a5   :  { %v540_v1 = vpop.f32.mrf.mxu0 }
 0x2a6   :  { %364 = vst [vmem:[#allocation10] sm:$0xff] %v361_v0 }
 0x2a7   :  { %641 = shalt.err (!%p638_p10)
}
 0x2a8   :  { %374 = dma.vmem_to_hbm [thread:$0]  %s372_s25, 128, %s801_s7, [#allocation4]  }
 0x2a9   :  { %656 = dma.done.wait [#allocation4], 128  }
 0x2aa   :  { %657 = vsyncadd [#allocation4], 4294967168 }
 0x2ab   :  { %378 = vsyncpa [#allocation3], 1 }
 0x2ac   :  { %379 = vsyncpa [#allocation6], 1 }
 0x2ad   :  { %380 = vsyncpa [#allocation9], 1 }
 0x2ae   :  { %381 = vsyncpa [#allocation4], 1 }

</bundles_post_ra>
